<compile_context>
chip_gen: v5e
topology: v5e:2x2
jax: 0.10.0
libtpu: 0.0.40
codegen_flags: <defaults>
</compile_context>

<pallas_src>
import jax
import jax.numpy as jnp
import numpy as np
from jax.experimental import pallas as pl
from jax.experimental.pallas import tpu as pltpu

_NEG_BIG = -1e30       # finite "-inf" sentinel (avoids inf/nan corner cases)
_LANE = 128            # TPU lane width
_MAX_ROWS = 512        # sublane rows per block: 512*128*4B = 256 KiB f32 per block


def _stats_kernel(preds_ref, labels_ref, stats_ref, m_acc, s_acc, cnt_acc):
    """Pass 1: per-lane online (max, sum-exp) over negatives + positive count.

    All per-step work is elementwise (VPU/EUP); the single cross-lane reduction
    happens once in the finalize branch."""
    k = pl.program_id(0)

    @pl.when(k == 0)
    def _init():
        m_acc[...] = jnp.full_like(m_acc, _NEG_BIG)
        s_acc[...] = jnp.zeros_like(s_acc)
        cnt_acc[...] = jnp.zeros_like(cnt_acc)

    x = preds_ref[...]                                   # (R, 128) f32
    lbl = labels_ref[...].astype(jnp.int32)              # int8 -> i32 for clean masks
    is_neg = lbl == 0                                    # padding (-1) excluded
    is_pos = lbl == 1

    m_old = m_acc[...]
    x_neg = jnp.where(is_neg, x, _NEG_BIG)
    m_new = jnp.maximum(m_old, x_neg)                    # per-lane running max
    # Clamp exponent so non-negative / padded lanes can never overflow.
    e = jnp.exp(jnp.minimum(x - m_new, 0.0))
    s_acc[...] = s_acc[...] * jnp.exp(m_old - m_new) + jnp.where(is_neg, e, 0.0)
    m_acc[...] = m_new
    cnt_acc[...] = cnt_acc[...] + is_pos.astype(jnp.float32)

    @pl.when(k == pl.num_programs(0) - 1)
    def _finalize():
        m_vec = m_acc[...]                               # (R, 128)
        m11 = jnp.max(m_vec, axis=1, keepdims=True)      # (R, 1)
        m11 = jnp.max(m11, axis=0, keepdims=True)        # (1, 1) global neg max
        w = s_acc[...] * jnp.exp(m_vec - m11)            # rescale partial sums
        s11 = jnp.sum(jnp.sum(w, axis=1, keepdims=True), axis=0, keepdims=True)
        lse11 = m11 + jnp.log(s11)                       # neg logsumexp
        c11 = jnp.sum(jnp.sum(cnt_acc[...], axis=1, keepdims=True),
                      axis=0, keepdims=True)
        stats_ref[0] = m11[0, 0]                         # neg_max
        stats_ref[1] = lse11[0, 0]                       # neg_lse
        stats_ref[2] = c11[0, 0]                         # #positives


def _loss_kernel(stats_ref, preds_ref, labels_ref, loss_acc_ref, match_ref):
    """Pass 2: probs_pos = sigmoid(x - neg_lse); accumulate masked loss in VMEM,
    write matches as int8."""
    k = pl.program_id(0)

    @pl.when(k == 0)
    def _init():
        loss_acc_ref[...] = jnp.zeros_like(loss_acc_ref)

    neg_max = stats_ref[0]                               # SMEM scalars
    neg_lse = stats_ref[1]

    x = preds_ref[...]                                   # (R, 128) f32
    lbl = labels_ref[...].astype(jnp.int32)
    is_pos = lbl == 1

    # probs_pos = exp(p) / (exp(p) + sum(exp(neg))) = sigmoid(p - neg_lse)
    z = x - neg_lse
    ez = jnp.exp(-jnp.abs(z))                            # in (0, 1], no overflow
    denom = 1.0 + ez
    r = pl.reciprocal(denom, approx=True)                # EUP
    r = r * (2.0 - denom * r)                            # one Newton step (cheap VPU)
    probs_pos = jnp.where(z >= 0.0, r, ez * r)

    loss = -(1.0 - probs_pos) * jnp.log(probs_pos + 1e-6)
    loss_acc_ref[...] = loss_acc_ref[...] + jnp.where(is_pos, loss, 0.0)

    # argmax(probs, -1) == 0  <=>  p >= max(neg)  (>= keeps torch's tie-break to 0).
    match_ref[...] = (x >= neg_max).astype(jnp.int8)


@jax.jit
def _contrastive_core(preds, labels):
    """Fixed-shape device-side core.  preds/labels: (B,) arrays.

    Returns (loss_sum, pos_count, matches_full) where matches_full is a (B,)
    bool array (only meaningful at positive positions)."""
    B = preds.shape[0]

    rows_needed = -(-B // _LANE)
    if rows_needed <= _MAX_ROWS:
        R = ((rows_needed + 7) // 8) * 8                 # single full-dim block
        rows = R
    else:
        R = _MAX_ROWS                                    # multiple of 32 (int8 safe)
        rows = ((rows_needed + R - 1) // R) * R
    nb = rows // R
    pad = rows * _LANE - B

    # TODO(synk): pad+reshape is one extra XLA copy of the inputs; unavoidable for
    # the lane/sublane-dense (rows, 128) view when B is not already a multiple.
    preds2 = jnp.pad(preds.astype(jnp.float32), (0, pad)).reshape(rows, _LANE)
    labels2 = jnp.pad(labels.astype(jnp.int8), (0, pad),
                      constant_values=-1).reshape(rows, _LANE)

    cparams = pltpu.CompilerParams(
        dimension_semantics=("arbitrary",),              # running reductions over blocks
        vmem_limit_bytes=32 * 1024 * 1024,
    )

    # Pass 1: global negative-class stats + positive count (SMEM scalar output).
    stats = pl.pallas_call(
        _stats_kernel,
        out_shape=jax.ShapeDtypeStruct((3,), jnp.float32),
        grid_spec=pltpu.PrefetchScalarGridSpec(
            num_scalar_prefetch=0,
            grid=(nb,),
            in_specs=[
                pl.BlockSpec((R, _LANE), lambda k: (k, 0)),
                pl.BlockSpec((R, _LANE), lambda k: (k, 0)),
            ],
            out_specs=pl.BlockSpec(memory_space=pltpu.MemorySpace.SMEM),
            scratch_shapes=[
                pltpu.VMEM((R, _LANE), jnp.float32),     # per-lane running neg max
                pltpu.VMEM((R, _LANE), jnp.float32),     # per-lane running sum-exp
                pltpu.VMEM((R, _LANE), jnp.float32),     # per-lane positive count
            ],
        ),
        compiler_params=cparams,
    )(preds2, labels2)

    # Pass 2: in-kernel loss reduction (resident accumulator output) + int8 matches.
    loss_acc, matches2 = pl.pallas_call(
        _loss_kernel,
        out_shape=(
            jax.ShapeDtypeStruct((R, _LANE), jnp.float32),
            jax.ShapeDtypeStruct((rows, _LANE), jnp.int8),
        ),
        grid_spec=pltpu.PrefetchScalarGridSpec(
            num_scalar_prefetch=0,
            grid=(nb,),
            in_specs=[
                pl.BlockSpec(memory_space=pltpu.MemorySpace.SMEM),   # stats scalars
                pl.BlockSpec((R, _LANE), lambda k: (k, 0)),
                pl.BlockSpec((R, _LANE), lambda k: (k, 0)),
            ],
            out_specs=(
                pl.BlockSpec((R, _LANE), lambda k: (0, 0)),          # resident accum
                pl.BlockSpec((R, _LANE), lambda k: (k, 0)),
            ),
        ),
        compiler_params=cparams,
    )(stats, preds2, labels2)

    loss_sum = jnp.sum(loss_acc)                         # tiny (R,128) final reduce
    pos_count = stats[2]
    matches_full = matches2.reshape(-1)[:B] != 0
    return loss_sum, pos_count, matches_full


def contrastive_loss(preds, labels, reduction="mean"):
    """Full module forward.  'mean' and 'sum' reductions supported (as in the spec)."""
    preds = jnp.asarray(preds).reshape(-1)
    labels = jnp.asarray(labels).reshape(-1)

    loss_sum, pos_count, matches_full = _contrastive_core(preds, labels)
    loss = loss_sum / pos_count if reduction == "mean" else loss_sum

    # Data-dependent output shape (one flag per positive) -> device gather + sync.
    matches = matches_full[labels == 1]
    return loss, matches


def _reference(pos, neg):
    """Pure-JAX reference matching the PyTorch forward."""
    P = pos.shape[0]
    scores = jnp.concatenate(
        [pos.reshape(P, 1),
         jnp.broadcast_to(neg.reshape(1, -1), (P, neg.shape[0]))],
        axis=1,
    )
    probs = jax.nn.softmax(scores, axis=-1)
    probs_pos = probs[:, 0:1]
    loss = (-(1 - probs_pos) * jnp.log(probs_pos + 1e-6)).mean()
    matches = jnp.argmax(probs, axis=1) == 0
    return loss, matches


if __name__ == "__main__":
    key = jax.random.PRNGKey(0)
    B = 16
    preds = jax.random.normal(key, (B,), dtype=jnp.float32)
    # Deterministic label pattern: 6 positives, 10 negatives.
    labels = jnp.array([1, 0, 0, 1, 0, 1, 0, 0, 1, 0, 0, 1, 0, 0, 1, 0],
                       dtype=jnp.int32)

    loss, matches = contrastive_loss(preds, labels, reduction="mean")
    loss = jax.block_until_ready(loss)
    matches = jax.block_until_ready(matches)

    # Sanity-check against a pure-JAX reference of the PyTorch forward.
    preds_np = np.asarray(preds)
    labels_np = np.asarray(labels)
    ref_loss, ref_matches = _reference(
        jnp.asarray(preds_np[labels_np == 1]),
        jnp.asarray(preds_np[labels_np == 0]),
    )
    assert np.allclose(np.asarray(loss), np.asarray(ref_loss), rtol=1e-4, atol=1e-6), \
        (float(loss), float(ref_loss))
    assert np.array_equal(np.asarray(matches), np.asarray(ref_matches))

    print("KERNEL_OK")
</pallas_src>

<mosaic_0001>
module attributes {stable_mosaic.version = 11 : i64} {
  func.func @_stats_kernel(%arg0: i32, %arg1: memref<8x128xf32, #tpu.memory_space<vmem>>, %arg2: memref<8x128xi8, #tpu.memory_space<vmem>>, %arg3: memref<3xf32, #tpu.memory_space<smem>>, %arg4: memref<8x128xf32, #tpu.memory_space<vmem>>, %arg5: memref<8x128xf32, #tpu.memory_space<vmem>>, %arg6: memref<8x128xf32, #tpu.memory_space<vmem>>) attributes {dimension_semantics = [#tpu.dimension_semantics<arbitrary>], iteration_bounds = array<i64: 1>, scalar_prefetch = 0 : i64, scratch_operands = 3 : i64, tpu.core_type = #tpu.core_type<tc>, window_params = [{transform_indices = @transform_0, window_bounds = array<i64: 8, 128>}, {transform_indices = @transform_1, window_bounds = array<i64: 8, 128>}, {transform_indices = @transform_2, window_bounds = array<i64: 3>}]} {
    %c0_i32 = arith.constant 0 : i32
    %0 = arith.cmpi eq, %arg0, %c0_i32 : i32
    %1 = arith.extui %0 : i1 to i32
    %c0_i32_0 = arith.constant 0 : i32
    %2 = arith.cmpi ne, %1, %c0_i32_0 : i32
    scf.if %2 {
      %cst_21 = arith.constant -1.000000e+30 : f32
      %35 = vector.broadcast %cst_21 : f32 to vector<8x128xf32>
      %c0_22 = arith.constant 0 : index
      %c0_23 = arith.constant 0 : index
      %36 = vector.load %arg4[%c0_22, %c0_23] : memref<8x128xf32, #tpu.memory_space<vmem>>, vector<8x128xf32>
      tpu.vector_store %arg4[%c0_22, %c0_23], %35 {strides = array<i32>} : memref<8x128xf32, #tpu.memory_space<vmem>>, vector<8x128xf32>,
      %cst_24 = arith.constant 0.000000e+00 : f32
      %37 = vector.broadcast %cst_24 : f32 to vector<8x128xf32>
      %c0_25 = arith.constant 0 : index
      %c0_26 = arith.constant 0 : index
      %38 = vector.load %arg5[%c0_25, %c0_26] : memref<8x128xf32, #tpu.memory_space<vmem>>, vector<8x128xf32>
      tpu.vector_store %arg5[%c0_25, %c0_26], %37 {strides = array<i32>} : memref<8x128xf32, #tpu.memory_space<vmem>>, vector<8x128xf32>,
      %cst_27 = arith.constant 0.000000e+00 : f32
      %39 = vector.broadcast %cst_27 : f32 to vector<8x128xf32>
      %c0_28 = arith.constant 0 : index
      %c0_29 = arith.constant 0 : index
      %40 = vector.load %arg6[%c0_28, %c0_29] : memref<8x128xf32, #tpu.memory_space<vmem>>, vector<8x128xf32>
      tpu.vector_store %arg6[%c0_28, %c0_29], %39 {strides = array<i32>} : memref<8x128xf32, #tpu.memory_space<vmem>>, vector<8x128xf32>,
    } else {
    }
    %c0 = arith.constant 0 : index
    %c0_1 = arith.constant 0 : index
    %3 = vector.load %arg1[%c0, %c0_1] : memref<8x128xf32, #tpu.memory_space<vmem>>, vector<8x128xf32>
    %c0_2 = arith.constant 0 : index
    %c0_3 = arith.constant 0 : index
    %4 = vector.load %arg2[%c0_2, %c0_3] : memref<8x128xi8, #tpu.memory_space<vmem>>, vector<8x128xi8>
    %5 = arith.extsi %4 : vector<8x128xi8> to vector<8x128xi32>
    %c0_i32_4 = arith.constant 0 : i32
    %6 = vector.broadcast %c0_i32_4 : i32 to vector<8x128xi32>
    %7 = arith.cmpi eq, %5, %6 : vector<8x128xi32>
    %c1_i32 = arith.constant 1 : i32
    %8 = vector.broadcast %c1_i32 : i32 to vector<8x128xi32>
    %9 = arith.cmpi eq, %5, %8 : vector<8x128xi32>
    %c0_5 = arith.constant 0 : index
    %c0_6 = arith.constant 0 : index
    %10 = vector.load %arg4[%c0_5, %c0_6] : memref<8x128xf32, #tpu.memory_space<vmem>>, vector<8x128xf32>
    %cst = arith.constant -1.000000e+30 : f32
    %11 = vector.broadcast %cst : f32 to vector<8x128xf32>
    %12 = arith.select %7, %3, %11 : vector<8x128xi1>, vector<8x128xf32>
    %13 = arith.maximumf %10, %12 : vector<8x128xf32>
    %14 = arith.subf %3, %13 : vector<8x128xf32>
    %cst_7 = arith.constant 0.000000e+00 : f32
    %15 = vector.broadcast %cst_7 : f32 to vector<8x128xf32>
    %16 = arith.minimumf %14, %15 : vector<8x128xf32>
    %17 = math.exp %16 : vector<8x128xf32>
    %c0_8 = arith.constant 0 : index
    %c0_9 = arith.constant 0 : index
    %18 = vector.load %arg5[%c0_8, %c0_9] : memref<8x128xf32, #tpu.memory_space<vmem>>, vector<8x128xf32>
    %19 = arith.subf %10, %13 : vector<8x128xf32>
    %20 = math.exp %19 : vector<8x128xf32>
    %21 = arith.mulf %18, %20 : vector<8x128xf32>
    %cst_10 = arith.constant 0.000000e+00 : f32
    %22 = vector.broadcast %cst_10 : f32 to vector<8x128xf32>
    %23 = arith.select %7, %17, %22 : vector<8x128xi1>, vector<8x128xf32>
    %24 = arith.addf %21, %23 : vector<8x128xf32>
    %c0_11 = arith.constant 0 : index
    %c0_12 = arith.constant 0 : index
    %25 = vector.load %arg5[%c0_11, %c0_12] : memref<8x128xf32, #tpu.memory_space<vmem>>, vector<8x128xf32>
    tpu.vector_store %arg5[%c0_11, %c0_12], %24 {strides = array<i32>} : memref<8x128xf32, #tpu.memory_space<vmem>>, vector<8x128xf32>,
    %c0_13 = arith.constant 0 : index
    %c0_14 = arith.constant 0 : index
    %26 = vector.load %arg4[%c0_13, %c0_14] : memref<8x128xf32, #tpu.memory_space<vmem>>, vector<8x128xf32>
    tpu.vector_store %arg4[%c0_13, %c0_14], %13 {strides = array<i32>} : memref<8x128xf32, #tpu.memory_space<vmem>>, vector<8x128xf32>,
    %c0_15 = arith.constant 0 : index
    %c0_16 = arith.constant 0 : index
    %27 = vector.load %arg6[%c0_15, %c0_16] : memref<8x128xf32, #tpu.memory_space<vmem>>, vector<8x128xf32>
    %28 = arith.extui %9 : vector<8x128xi1> to vector<8x128xi32>
    %29 = arith.sitofp %28 : vector<8x128xi32> to vector<8x128xf32>
    %30 = arith.addf %27, %29 : vector<8x128xf32>
    %c0_17 = arith.constant 0 : index
    %c0_18 = arith.constant 0 : index
    %31 = vector.load %arg6[%c0_17, %c0_18] : memref<8x128xf32, #tpu.memory_space<vmem>>, vector<8x128xf32>
    tpu.vector_store %arg6[%c0_17, %c0_18], %30 {strides = array<i32>} : memref<8x128xf32, #tpu.memory_space<vmem>>, vector<8x128xf32>,
    %c0_i32_19 = arith.constant 0 : i32
    %32 = arith.cmpi eq, %arg0, %c0_i32_19 : i32
    %33 = arith.extui %32 : i1 to i32
    %c0_i32_20 = arith.constant 0 : i32
    %34 = arith.cmpi ne, %33, %c0_i32_20 : i32
    scf.if %34 {
      %c0_21 = arith.constant 0 : index
      %c0_22 = arith.constant 0 : index
      %35 = vector.load %arg4[%c0_21, %c0_22] : memref<8x128xf32, #tpu.memory_space<vmem>>, vector<8x128xf32>
      %cst_23 = arith.constant dense<0xFF800000> : vector<8xf32>
      %36 = vector.multi_reduction <maximumf>, %35, %cst_23 [1] : vector<8x128xf32> to vector<8xf32>
      %37 = vector.shape_cast %36 : vector<8xf32> to vector<8x1xf32>
      %cst_24 = arith.constant dense<0xFF800000> : vector<1xf32>
      %38 = vector.multi_reduction <maximumf>, %37, %cst_24 [0] : vector<8x1xf32> to vector<1xf32>
      %39 = vector.shape_cast %38 : vector<1xf32> to vector<1x1xf32>
      %c0_25 = arith.constant 0 : index
      %c0_26 = arith.constant 0 : index
      %40 = vector.load %arg5[%c0_25, %c0_26] : memref<8x128xf32, #tpu.memory_space<vmem>>, vector<8x128xf32>
      %41 = vector.broadcast %39 : vector<1x1xf32> to vector<8x128xf32>
      %42 = arith.subf %35, %41 : vector<8x128xf32>
      %43 = math.exp %42 : vector<8x128xf32>
      %44 = arith.mulf %40, %43 : vector<8x128xf32>
      %cst_27 = arith.constant dense<0.000000e+00> : vector<8xf32>
      %45 = vector.multi_reduction <add>, %44, %cst_27 [1] : vector<8x128xf32> to vector<8xf32>
      %46 = vector.shape_cast %45 : vector<8xf32> to vector<8x1xf32>
      %cst_28 = arith.constant dense<0.000000e+00> : vector<1xf32>
      %47 = vector.multi_reduction <add>, %46, %cst_28 [0] : vector<8x1xf32> to vector<1xf32>
      %48 = vector.shape_cast %47 : vector<1xf32> to vector<1x1xf32>
      %49 = math.log %48 : vector<1x1xf32>
      %50 = arith.addf %39, %49 : vector<1x1xf32>
      %c0_29 = arith.constant 0 : index
      %c0_30 = arith.constant 0 : index
      %51 = vector.load %arg6[%c0_29, %c0_30] : memref<8x128xf32, #tpu.memory_space<vmem>>, vector<8x128xf32>
      %cst_31 = arith.constant dense<0.000000e+00> : vector<8xf32>
      %52 = vector.multi_reduction <add>, %51, %cst_31 [1] : vector<8x128xf32> to vector<8xf32>
      %53 = vector.shape_cast %52 : vector<8xf32> to vector<8x1xf32>
      %cst_32 = arith.constant dense<0.000000e+00> : vector<1xf32>
      %54 = vector.multi_reduction <add>, %53, %cst_32 [0] : vector<8x1xf32> to vector<1xf32>
      %55 = vector.shape_cast %54 : vector<1xf32> to vector<1x1xf32>
      %56 = vector.extract %39[0, 0] : f32 from vector<1x1xf32>
      %c0_33 = arith.constant 0 : index
      %57 = memref.load %arg3[%c0_33] : memref<3xf32, #tpu.memory_space<smem>>
      memref.store %56, %arg3[%c0_33] : memref<3xf32, #tpu.memory_space<smem>>
      %58 = vector.extract %50[0, 0] : f32 from vector<1x1xf32>
      %c1 = arith.constant 1 : index
      %59 = memref.load %arg3[%c1] : memref<3xf32, #tpu.memory_space<smem>>
      memref.store %58, %arg3[%c1] : memref<3xf32, #tpu.memory_space<smem>>
      %60 = vector.extract %55[0, 0] : f32 from vector<1x1xf32>
      %c2 = arith.constant 2 : index
      %61 = memref.load %arg3[%c2] : memref<3xf32, #tpu.memory_space<smem>>
      memref.store %60, %arg3[%c2] : memref<3xf32, #tpu.memory_space<smem>>
    } else {
    }
    return
  }
  func.func @transform_0(%arg0: i32) -> (i32, i32) {
    %c0_i32 = arith.constant 0 : i32
    %c0_i32_0 = arith.constant 0 : i32
    return %arg0, %c0_i32 : i32, i32
  }
  func.func @transform_1(%arg0: i32) -> (i32, i32) {
    %c0_i32 = arith.constant 0 : i32
    %c0_i32_0 = arith.constant 0 : i32
    return %arg0, %c0_i32 : i32, i32
  }
  func.func @transform_2(%arg0: i32) -> i32 {
    %c0_i32 = arith.constant 0 : i32
    %c0_i32_0 = arith.constant 0 : i32
    return %c0_i32 : i32
  }
}

module attributes {stable_mosaic.version = 11 : i64} {
  func.func @_loss_kernel(%arg0: i32, %arg1: memref<3xf32, #tpu.memory_space<smem>>, %arg2: memref<8x128xf32, #tpu.memory_space<vmem>>, %arg3: memref<8x128xi8, #tpu.memory_space<vmem>>, %arg4: memref<8x128xf32, #tpu.memory_space<vmem>>, %arg5: memref<8x128xi8, #tpu.memory_space<vmem>>) attributes {dimension_semantics = [#tpu.dimension_semantics<arbitrary>], iteration_bounds = array<i64: 1>, scalar_prefetch = 0 : i64, scratch_operands = 0 : i64, tpu.core_type = #tpu.core_type<tc>, window_params = [{transform_indices = @transform_0, window_bounds = array<i64: 3>}, {transform_indices = @transform_1, window_bounds = array<i64: 8, 128>}, {transform_indices = @transform_2, window_bounds = array<i64: 8, 128>}, {pipeline_mode = #tpu.pipeline_mode<synchronous>, transform_indices = @transform_3, window_bounds = array<i64: 8, 128>}, {transform_indices = @transform_4, window_bounds = array<i64: 8, 128>}]} {
    %c0_i32 = arith.constant 0 : i32
    %0 = arith.cmpi eq, %arg0, %c0_i32 : i32
    %1 = arith.extui %0 : i1 to i32
    %c0_i32_0 = arith.constant 0 : i32
    %2 = arith.cmpi ne, %1, %c0_i32_0 : i32
    scf.if %2 {
      %cst_18 = arith.constant 0.000000e+00 : f32
      %44 = vector.broadcast %cst_18 : f32 to vector<8x128xf32>
      %c0_19 = arith.constant 0 : index
      %c0_20 = arith.constant 0 : index
      %45 = vector.load %arg4[%c0_19, %c0_20] : memref<8x128xf32, #tpu.memory_space<vmem>>, vector<8x128xf32>
      tpu.vector_store %arg4[%c0_19, %c0_20], %44 {strides = array<i32>} : memref<8x128xf32, #tpu.memory_space<vmem>>, vector<8x128xf32>,
    } else {
    }
    %c0 = arith.constant 0 : index
    %3 = memref.load %arg1[%c0] : memref<3xf32, #tpu.memory_space<smem>>
    %c1 = arith.constant 1 : index
    %4 = memref.load %arg1[%c1] : memref<3xf32, #tpu.memory_space<smem>>
    %c0_1 = arith.constant 0 : index
    %c0_2 = arith.constant 0 : index
    %5 = vector.load %arg2[%c0_1, %c0_2] : memref<8x128xf32, #tpu.memory_space<vmem>>, vector<8x128xf32>
    %c0_3 = arith.constant 0 : index
    %c0_4 = arith.constant 0 : index
    %6 = vector.load %arg3[%c0_3, %c0_4] : memref<8x128xi8, #tpu.memory_space<vmem>>, vector<8x128xi8>
    %7 = arith.extsi %6 : vector<8x128xi8> to vector<8x128xi32>
    %c1_i32 = arith.constant 1 : i32
    %8 = vector.broadcast %c1_i32 : i32 to vector<8x128xi32>
    %9 = arith.cmpi eq, %7, %8 : vector<8x128xi32>
    %10 = vector.broadcast %4 : f32 to vector<8x128xf32>
    %11 = arith.subf %5, %10 : vector<8x128xf32>
    %12 = math.absf %11 : vector<8x128xf32>
    %cst = arith.constant 0.000000e+00 : f32
    %13 = vector.broadcast %cst : f32 to vector<8x128xf32>
    %14 = arith.subf %13, %12 : vector<8x128xf32>
    %15 = math.exp %14 : vector<8x128xf32>
    %cst_5 = arith.constant 1.000000e+00 : f32
    %16 = vector.broadcast %cst_5 : f32 to vector<8x128xf32>
    %17 = arith.addf %16, %15 : vector<8x128xf32>
    %18 = tpu.reciprocal %17 {approx = true} : vector<8x128xf32> -> vector<8x128xf32>
    %19 = arith.mulf %17, %18 : vector<8x128xf32>
    %cst_6 = arith.constant 2.000000e+00 : f32
    %20 = vector.broadcast %cst_6 : f32 to vector<8x128xf32>
    %21 = arith.subf %20, %19 : vector<8x128xf32>
    %22 = arith.mulf %18, %21 : vector<8x128xf32>
    %cst_7 = arith.constant 0.000000e+00 : f32
    %23 = vector.broadcast %cst_7 : f32 to vector<8x128xf32>
    %24 = arith.cmpf oge, %11, %23 : vector<8x128xf32>
    %25 = arith.mulf %15, %22 : vector<8x128xf32>
    %26 = arith.select %24, %22, %25 : vector<8x128xi1>, vector<8x128xf32>
    %cst_8 = arith.constant 1.000000e+00 : f32
    %27 = vector.broadcast %cst_8 : f32 to vector<8x128xf32>
    %28 = arith.subf %27, %26 : vector<8x128xf32>
    %cst_9 = arith.constant 0.000000e+00 : f32
    %29 = vector.broadcast %cst_9 : f32 to vector<8x128xf32>
    %30 = arith.subf %29, %28 : vector<8x128xf32>
    %cst_10 = arith.constant 9.99999997E-7 : f32
    %31 = vector.broadcast %cst_10 : f32 to vector<8x128xf32>
    %32 = arith.addf %26, %31 : vector<8x128xf32>
    %33 = math.log %32 : vector<8x128xf32>
    %34 = arith.mulf %30, %33 : vector<8x128xf32>
    %c0_11 = arith.constant 0 : index
    %c0_12 = arith.constant 0 : index
    %35 = vector.load %arg4[%c0_11, %c0_12] : memref<8x128xf32, #tpu.memory_space<vmem>>, vector<8x128xf32>
    %cst_13 = arith.constant 0.000000e+00 : f32
    %36 = vector.broadcast %cst_13 : f32 to vector<8x128xf32>
    %37 = arith.select %9, %34, %36 : vector<8x128xi1>, vector<8x128xf32>
    %38 = arith.addf %35, %37 : vector<8x128xf32>
    %c0_14 = arith.constant 0 : index
    %c0_15 = arith.constant 0 : index
    %39 = vector.load %arg4[%c0_14, %c0_15] : memref<8x128xf32, #tpu.memory_space<vmem>>, vector<8x128xf32>
    tpu.vector_store %arg4[%c0_14, %c0_15], %38 {strides = array<i32>} : memref<8x128xf32, #tpu.memory_space<vmem>>, vector<8x128xf32>,
    %40 = vector.broadcast %3 : f32 to vector<8x128xf32>
    %41 = arith.cmpf oge, %5, %40 : vector<8x128xf32>
    %42 = arith.extui %41 : vector<8x128xi1> to vector<8x128xi8>
    %c0_16 = arith.constant 0 : index
    %c0_17 = arith.constant 0 : index
    %43 = vector.load %arg5[%c0_16, %c0_17] : memref<8x128xi8, #tpu.memory_space<vmem>>, vector<8x128xi8>
    tpu.vector_store %arg5[%c0_16, %c0_17], %42 {strides = array<i32>} : memref<8x128xi8, #tpu.memory_space<vmem>>, vector<8x128xi8>,
    return
  }
  func.func @transform_0(%arg0: i32) -> i32 {
    %c0_i32 = arith.constant 0 : i32
    %c0_i32_0 = arith.constant 0 : i32
    return %c0_i32 : i32
  }
  func.func @transform_1(%arg0: i32) -> (i32, i32) {
    %c0_i32 = arith.constant 0 : i32
    %c0_i32_0 = arith.constant 0 : i32
    return %arg0, %c0_i32 : i32, i32
  }
  func.func @transform_2(%arg0: i32) -> (i32, i32) {
    %c0_i32 = arith.constant 0 : i32
    %c0_i32_0 = arith.constant 0 : i32
    return %arg0, %c0_i32 : i32, i32
  }
  func.func @transform_3(%arg0: i32) -> (i32, i32) {
    %c0_i32 = arith.constant 0 : i32
    %c0_i32_0 = arith.constant 0 : i32
    %c0_i32_1 = arith.constant 0 : i32
    return %c0_i32, %c0_i32_0 : i32, i32
  }
  func.func @transform_4(%arg0: i32) -> (i32, i32) {
    %c0_i32 = arith.constant 0 : i32
    %c0_i32_0 = arith.constant 0 : i32
    return %arg0, %c0_i32 : i32, i32
  }
}

</mosaic_0001>

<bundles_post_ra>
// kernel: _contrastive_core.2
= control target key start
LH: loop header
LB: loop body
LE: loop exit
PB: predicated region body
PF: predicated region fallthrough
CT: control target
= control target key end

     0   :  { %s171_s0 = inlined_call_operand.vmem [shape: f32[8,128], index: 0, kind: input, shape index: {}]   ;;  %s172_s1 = inlined_call_operand.vmem [shape: s8[8,128], index: 1, kind: input, shape index: {}]   ;;  %s173_s2 = inlined_call_operand.vmem [shape: f32[3], index: 2, kind: output, shape index: {}]  }
   0x1   :  { %v20_v0 = vld [vmem:[%s172_s1] sm:$0x3] }
   0x2   :  { %7 = vsyncpa [#allocation6], 0  ;;  %v19_v1 = vld [vmem:[%s171_s0] sm:$0xff]  ;;  %v21_v2 = vunpack.c.0.s8 %v20_v0  ;;  %v137_v6 = vmov 0.0   ;;  %s96_s14 = sshll.u32 %s173_s2, 4  ;;  %s138_s17 = smov [#allocation5]   ;;  %s97_s14 = int_to_ptr.vmem [resolvable:$true] %s96_s14 }
   0x4   :  { %vm160_vm0 = vcmp.eq.s32.totalorder %v21_v2, 0  ;;  %vm23_vm1 = vcmp.eq.s32.totalorder %v21_v2, 1 }
   0x5   :  { %v25_v4 = vsel %vm160_vm0, %v19_v1, -1e+30  ;;  %v106_v7 = vsel %vm23_vm1, 1.0, %v137_v6 }
   0x6   :  { %v26_v5 = vmax.f32 %v25_v4, -1e+30  ;;  %74 = vadd.xlane.f32.xlu1 %v106_v7 }
   0x8   :  { %49 = vmax.xlane.f32.xlu0 %v26_v5  ;;  %v27_v8 = vsub.f32 %v19_v1, %v26_v5  ;;  %v32_v9 = vsub.f32 -1e+30, %v26_v5 }
   0xa   :  { %v28_v10 = vmin.f32 %v27_v8, 0.0  ;;  %v33_v14 = vmul.f32 1.442695, %v32_v9 }
   0xc   :  { %v29_v15 = vmul.f32 1.442695, %v28_v10  ;;  %115 = vpow2.f32 %v33_v14 }
   0xe   :  { %117 = vpow2.f32 %v29_v15 }
  0x12   :  { %v116_v20 = vpop.eup %115 }
  0x13   :  { %v35_v24 = vmul.f32 0.0, %v116_v20 }
  0x14   :  { %v118_v22 = vpop.eup %117 }
  0x15   :  { %v36_v25 = vsel %vm160_vm0, %v118_v22, 0.0 }
  0x16   :  { %v37_v26 = vadd.f32 %v36_v25, %v35_v24 }
  0x79   :  { %v75_v30 = vpop.xlane.xlu1 %74 }
  0x7a   :  { %v76_v33 = vrot.slane %v75_v30, 4 }
  0x7b   :  { %v50_v11 = vpop.xlane.xlu0 %49 }
  0x7c   :  { %v51_v12 = vrot.slane %v50_v11, 4  ;;  %v77_v36 = vadd.f32 %v76_v33, %v75_v30 }
  0x7e   :  { %v52_v13 = vmax.f32 %v50_v11, %v51_v12  ;;  %v78_v39 = vrot.slane %v77_v36, 2 }
  0x80   :  { %v53_v16 = vrot.slane %v52_v13, 2  ;;  %v79_v40 = vadd.f32 %v78_v39, %v77_v36 }
  0x82   :  { %v54_v17 = vmax.f32 %v52_v13, %v53_v16  ;;  %v80_v42 = vrot.slane %v79_v40, 1 }
  0x84   :  { %v55_v18 = vrot.slane %v54_v17, 1  ;;  %v81_v45 = vadd.f32 %v80_v42, %v79_v40 }
  0x86   :  { %v56_v19 = vmax.f32 %v54_v17, %v55_v18 }
  0x88   :  { %v58_v21 = vsub.f32 %v26_v5, %v56_v19  ;;  %107 = vpush %v56_v19 }
  0x8a   :  { %v59_v23 = vmul.f32 1.442695, %v58_v21 }
  0x8c   :  { %119 = vpow2.f32 %v59_v23 }
  0x92   :  { %v120_v27 = vpop.eup %119 }
  0x93   :  { %v61_v28 = vmul.f32 %v120_v27, %v37_v26 }
  0x95   :  { %62 = vadd.xlane.f32.xlu0 %v61_v28 }
  0xb9   :  { %s108_s0 = spop %107 }
  0xba   :  { %84 = sst [smem:[#allocation5]] %s108_s0 }
 0x108   :  { %v63_v29 = vpop.xlane.xlu0 %62 }
 0x109   :  { %v64_v31 = vrot.slane %v63_v29, 4 }
 0x10b   :  { %v65_v32 = vadd.f32 %v64_v31, %v63_v29 }
 0x10d   :  { %v66_v34 = vrot.slane %v65_v32, 2 }
 0x10f   :  { %v67_v35 = vadd.f32 %v66_v34, %v65_v32 }
 0x111   :  { %v68_v37 = vrot.slane %v67_v35, 1 }
 0x113   :  { %v69_v38 = vadd.f32 %v68_v37, %v67_v35 }
 0x115   :  { %121 = vlog2.f32 %v69_v38 }
 0x11b   :  { %v122_v41 = vpop.eup %121 }
 0x11c   :  { %v71_v43 = vmul.f32 0.6931472, %v122_v41 }
 0x11e   :  { %v72_v44 = vadd.f32 %v71_v43, %v56_v19 }
 0x120   :  { %109 = vpush %v72_v44 }
 0x121   :  { %111 = vpush %v81_v45 }
 0x151   :  { %s110_s15 = spop %109 }
 0x152   :  { %87 = sst [smem:[#allocation5 + $0x1]] %s110_s15  ;;  %s112_s16 = spop %111 }
 0x153   :  { %90 = sst [smem:[#allocation5 + $0x2]] %s112_s16 }
 0x154   :  { %99 = dma.smem_to_vmem %s138_s17, 16, %s97_s14, [#allocation6]  }
 0x155   :  { %135 = dma.done.wait [#allocation6], 16  }
 0x156   :  { %136 = vsyncadd [#allocation6], 4294967280 }
 0x157   :  { %104 = sfence }
 0x158   :  { %105 = vsyncpa [#allocation6], 1 }

// kernel: _contrastive_core.3
= control target key start
LH: loop header
LB: loop body
LE: loop exit
PB: predicated region body
PF: predicated region fallthrough
CT: control target
= control target key end

     0   :  { %10 = vsyncpa [#allocation3], 0  ;;  %s108_s18 = smov [#allocation2]   ;;  %s150_s0 = inlined_call_operand.vmem [shape: f32[3], index: 0, kind: input, shape index: {}]   ;;  %s151_s1 = inlined_call_operand.vmem [shape: f32[8,128], index: 1, kind: input, shape index: {}]   ;;  %s152_s2 = inlined_call_operand.vmem [shape: s8[8,128], index: 2, kind: input, shape index: {}]   ;;  %s153_s3 = inlined_call_operand.vmem [shape: f32[8,128], index: 3, kind: output, shape index: {0}]   ;;  %s154_s4 = inlined_call_operand.vmem [shape: s8[8,128], index: 4, kind: output, shape index: {1}]  }
   0x1   :  { %s16_s17 = sshll.u32 %s150_s0, 4  ;;  %s17_s17 = int_to_ptr.vmem [resolvable:$true] %s16_s17 }
   0x2   :  { %19 = dma.vmem_to_smem %s17_s17, 16, %s108_s18, [#allocation3]  }
   0x3   :  { %106 = dma.done.wait [#allocation3], 16  }
   0x4   :  { %107 = vsyncadd [#allocation3], 4294967280 }
   0x5   :  { %28 = sfence }
   0x6   :  { %s84_s19 = sld [smem:[#allocation2 + $0x1]]  ;;  %v38_v0 = vld [vmem:[%s151_s1] sm:$0xff]  ;;  %v109_v7 = vmov 0  }
   0x7   :  { %s36_s22 = sld [smem:[#allocation2]]  ;;  %v39_v20 = vld [vmem:[%s152_s2] sm:$0x3] }
   0x8   :  { %v40_v22 = vunpack.c.0.s8 %v39_v20 }
   0xa   :  { %vm41_vm4 = vcmp.eq.s32.totalorder %v40_v22, 1 }
   0xc   :  { %v42_v1 = vstv %s84_s19 }
   0xd   :  { %v43_v2 = vsub.f32 %v38_v0, %v42_v1  ;;  %v66_v6 = vstv %s36_s22 }
   0xe   :  { %vm67_vm0 = vcmp.ge.f32.partialorder %v38_v0, %v66_v6 }
   0xf   :  { %v44_v3 = vand.u32 2147483647, %v43_v2  ;;  %vm68_vm1 = vmpackc.low %vm67_vm0, %vm67_vm0  ;;  %vm53_vm3 = vcmp.ge.f32.partialorder %v43_v2, 0.0 }
  0x10   :  { %v69_v8 = vsel %vm68_vm1, 16711935, %v109_v7 }
  0x11   :  { %v45_v4 = vsub.f32 0.0, %v44_v3  ;;  %v71_v9 = vpack.c.b8 %v69_v8, %v69_v8 }
  0x13   :  { %v46_v5 = vmul.f32 1.442695, %v45_v4  ;;  %vm72_vm2 = vnez %v71_v9 }
  0x14   :  { %v73_v12 = vsel %vm72_vm2, 16843009, %v109_v7 }
  0x15   :  { %88 = vpow2.f32 %v46_v5  ;;  %74 = vst [vmem:[%s154_s4] sm:$0x3] %v73_v12 }
  0x1b   :  { %v89_v10 = vpop.eup %88 }
  0x1c   :  { %v48_v11 = vadd.f32 1.0, %v89_v10 }
  0x1e   :  { %90 = vrcp.f32 %v48_v11 }
  0x24   :  { %v91_v13 = vpop.eup %90 }
  0x25   :  { %v50_v14 = vmul.f32 %v91_v13, %v48_v11 }
  0x27   :  { %v51_v15 = vsub.f32 2.0, %v50_v14 }
  0x29   :  { %v52_v16 = vmul.f32 %v91_v13, %v51_v15 }
  0x2b   :  { %v54_v17 = vmul.f32 %v89_v10, %v52_v16 }
  0x2d   :  { %v55_v18 = vsel %vm53_vm3, %v52_v16, %v54_v17 }
  0x2e   :  { %v58_v19 = vadd.f32 1e-06, %v55_v18  ;;  %v56_v21 = vsub.f32 1.0, %v55_v18 }
  0x30   :  { %92 = vlog2.f32 %v58_v19  ;;  %v57_v23 = vsub.f32 0.0, %v56_v21 }
  0x36   :  { %v93_v24 = vpop.eup %92 }
  0x37   :  { %v60_v25 = vmul.f32 0.6931472, %v93_v24 }
  0x39   :  { %v61_v26 = vmul.f32 %v60_v25, %v57_v23 }
  0x3b   :  { %v63_v27 = vsel %vm41_vm4, %v61_v26, 0.0 }
  0x3c   :  { %65 = vst [vmem:[%s153_s3] sm:$0xff] %v63_v27 }
  0x3d   :  { %83 = vsyncpa [#allocation3], 1 }

</bundles_post_ra>
